<compile_context>
chip_gen: v6e
topology: v6e:2x2x1
jax: 0.10.0
libtpu: 0.0.40
codegen_flags: <defaults>
</compile_context>

<pallas_src>
import functools
import math

import jax
import jax.numpy as jnp
from jax import lax
from jax.experimental import pallas as pl
from jax.experimental.pallas import tpu as pltpu

# ----------------------------- toy config ------------------------------------
BATCH = 2
SEQ = 8
HIDDEN = 32
LN_EPS = 1e-12

_INV_SQRT2 = 1.0 / math.sqrt(2.0)
_LANE = 128
_SUBLANE = 8


def _round_up(x: int, m: int) -> int:
    return ((x + m - 1) // m) * m


# ----------------------------- Pallas kernel ---------------------------------
def _head_transform_kernel(x_ref, w_ref, b_ref, gamma_ref, beta_ref, out_ref,
                           *, h_true: int, ln_eps: float):
    x = x_ref[...]                                   # (tm, Hp) bf16
    w = w_ref[...]                                   # (Hp, Hp) bf16

    # Dense: one wide MXU matmul (bf16 inputs, f32 accumulation) + bias.
    h = jnp.dot(x, w, preferred_element_type=jnp.float32) + b_ref[...]

    # Exact GELU (matches torch.nn.functional.gelu / HF ACT2FN["gelu"]).
    # TODO(synk): other config.hidden_act strings (gelu_new, relu, ...) are not
    # exercised by the default CANINE config and are omitted.
    h = 0.5 * h * (1.0 + lax.erf(h * _INV_SQRT2))

    # LayerNorm over the true hidden dim.  Padded lanes of h are exactly zero
    # (zero-padded W columns + zero bias, gelu(0)=0), so sums over the padded
    # width equal sums over the true width; divide by h_true, mask the
    # centered tensor so padded lanes don't pollute the variance.
    inv_h = 1.0 / float(h_true)
    mean = jnp.sum(h, axis=-1, keepdims=True) * inv_h
    centered = h - mean
    h_pad = h.shape[-1]
    if h_pad != h_true:
        lane = lax.broadcasted_iota(jnp.int32, (1, h_pad), 1)
        centered = jnp.where(lane < h_true, centered, 0.0)
    var = jnp.sum(centered * centered, axis=-1, keepdims=True) * inv_h
    normed = centered * lax.rsqrt(var + ln_eps)

    out_ref[...] = normed * gamma_ref[...] + beta_ref[...]


# ----------------------------- wrapper ----------------------------------------
def _pick_row_tile(m: int, h_pad: int, budget_bytes: int = 4 << 20) -> int:
    """VMEM-budget-based row tile.

    Budget covers one bf16 x tile + one f32 out tile, each double-buffered by
    the BlockSpec pipeline (the invariant W/vec blocks are single-buffered).
    Also forces >= 2 grid steps so v7x's second TensorCore is never idle.
    """
    per_row = 2 * (2 + 4) * h_pad                 # 2 bufs * (bf16 x + f32 out)
    t = max(_SUBLANE, budget_bytes // per_row)
    t = min(t, _round_up(pl.cdiv(m, 2), _SUBLANE))   # >= 2 grid steps
    t = max(_SUBLANE, (t // _SUBLANE) * _SUBLANE)    # multiple of 8 sublanes
    return t


def canine_prediction_head_transform(hidden_states, params):
    """hidden_states: (B, S, H) f32. params: w (H,H) [in,out], b/gamma/beta (1,H)."""
    B, S, H = hidden_states.shape
    M = B * S
    Hp = _round_up(H, _LANE)                      # lane-dense hidden width

    tile_m = _pick_row_tile(M, Hp)
    n_row = pl.cdiv(M, tile_m)
    Mp = n_row * tile_m                           # row tail zero-padded

    # Lane-dense (rows, hidden) slab, bf16 for the MXU / HBM traffic.
    x2 = jnp.zeros((Mp, Hp), jnp.bfloat16).at[:M, :H].set(
        hidden_states.reshape(M, H).astype(jnp.bfloat16))

    w = jnp.zeros((Hp, Hp), jnp.bfloat16).at[:H, :H].set(
        params["w"].astype(jnp.bfloat16))

    def _pad_vec(v):
        return jnp.zeros((1, Hp), jnp.float32).at[:, :H].set(
            v.reshape(1, H).astype(jnp.float32))

    b = _pad_vec(params["b"])
    gamma = _pad_vec(params["ln_gamma"])
    beta = _pad_vec(params["ln_beta"])

    kernel = functools.partial(_head_transform_kernel, h_true=H, ln_eps=LN_EPS)

    row_spec = pl.BlockSpec((tile_m, Hp), lambda i: (i, 0))
    # Loop-invariant blocks: constant index_map, fetched once, single-buffered.
    w_spec = pl.BlockSpec((Hp, Hp), lambda i: (0, 0),
                          pipeline_mode=pl.Buffered(1))
    vec_spec = pl.BlockSpec((1, Hp), lambda i: (0, 0),
                            pipeline_mode=pl.Buffered(1))

    out2 = pl.pallas_call(
        kernel,
        out_shape=jax.ShapeDtypeStruct((Mp, Hp), jnp.float32),
        grid=(n_row,),
        in_specs=[
            row_spec,   # x (bf16)
            w_spec,     # dense weight (in, out), bf16
            vec_spec,   # dense bias (f32)
            vec_spec,   # LayerNorm gamma (f32)
            vec_spec,   # LayerNorm beta (f32)
        ],
        out_specs=row_spec,
        compiler_params=pltpu.CompilerParams(
            # Independent row tiles -> shard across v7x's 2 TensorCores;
            # harmless no-op on single-TC v5e/v6e.
            dimension_semantics=("parallel",),
        ),
    )(x2, w, b, gamma, beta)

    return out2[:M, :H].reshape(B, S, H)


# ----------------------------- pure-JAX f32 reference --------------------------
def canine_prediction_head_transform_ref(hidden_states, params):
    h = hidden_states @ params["w"] + params["b"]
    h = 0.5 * h * (1.0 + lax.erf(h * _INV_SQRT2))
    mean = jnp.mean(h, axis=-1, keepdims=True)
    var = jnp.mean((h - mean) ** 2, axis=-1, keepdims=True)
    normed = (h - mean) / jnp.sqrt(var + LN_EPS)
    return normed * params["ln_gamma"] + params["ln_beta"]


# ----------------------------- main --------------------------------------------
if __name__ == "__main__":
    key = jax.random.PRNGKey(0)
    k_w, k_b, k_g, k_be, k_x = jax.random.split(key, 5)

    bound = 1.0 / math.sqrt(HIDDEN)
    params = dict(
        w=jax.random.uniform(k_w, (HIDDEN, HIDDEN), jnp.float32, -bound, bound),
        b=jax.random.uniform(k_b, (1, HIDDEN), jnp.float32, -bound, bound),
        ln_gamma=1.0 + 0.1 * jax.random.normal(k_g, (1, HIDDEN), jnp.float32),
        ln_beta=0.1 * jax.random.normal(k_be, (1, HIDDEN), jnp.float32),
    )

    x = jax.random.normal(k_x, (BATCH, SEQ, HIDDEN), jnp.float32)

    out = canine_prediction_head_transform(x, params)
    out = jax.block_until_ready(out)

    ref = canine_prediction_head_transform_ref(x, params)
    assert out.shape == (BATCH, SEQ, HIDDEN)
    # bf16 MXU path vs f32 reference -> relaxed tolerance.
    assert jnp.allclose(out, ref, atol=5e-2, rtol=5e-2), "mismatch vs reference"

    print("KERNEL_OK")
</pallas_src>

<mosaic_0001>
module attributes {stable_mosaic.version = 11 : i64} {
  func.func @_head_transform_kernel(%arg0: i32, %arg1: memref<8x128xbf16, #tpu.memory_space<vmem>>, %arg2: memref<128x128xbf16, #tpu.memory_space<vmem>>, %arg3: memref<1x128xf32, #tpu.memory_space<vmem>>, %arg4: memref<1x128xf32, #tpu.memory_space<vmem>>, %arg5: memref<1x128xf32, #tpu.memory_space<vmem>>, %arg6: memref<8x128xf32, #tpu.memory_space<vmem>>) attributes {dimension_semantics = [#tpu.dimension_semantics<parallel>], iteration_bounds = array<i64: 2>, scalar_prefetch = 0 : i64, scratch_operands = 0 : i64, tpu.core_type = #tpu.core_type<tc>, window_params = [{transform_indices = @transform_0, window_bounds = array<i64: 8, 128>}, {pipeline_mode = #tpu.pipeline_mode<synchronous>, transform_indices = @transform_1, window_bounds = array<i64: 128, 128>}, {pipeline_mode = #tpu.pipeline_mode<synchronous>, transform_indices = @transform_2, window_bounds = array<i64: 1, 128>}, {pipeline_mode = #tpu.pipeline_mode<synchronous>, transform_indices = @transform_3, window_bounds = array<i64: 1, 128>}, {pipeline_mode = #tpu.pipeline_mode<synchronous>, transform_indices = @transform_4, window_bounds = array<i64: 1, 128>}, {transform_indices = @transform_5, window_bounds = array<i64: 8, 128>}]} {
    %c0 = arith.constant 0 : index
    %c0_0 = arith.constant 0 : index
    %0 = vector.load %arg1[%c0, %c0_0] : memref<8x128xbf16, #tpu.memory_space<vmem>>, vector<8x128xbf16>
    %c0_1 = arith.constant 0 : index
    %c0_2 = arith.constant 0 : index
    %1 = vector.load %arg2[%c0_1, %c0_2] : memref<128x128xbf16, #tpu.memory_space<vmem>>, vector<128x128xbf16>
    %cst = arith.constant dense<0.000000e+00> : vector<8x128xf32>
    %2 = tpu.matmul %0, %1, %cst {dimension_numbers = #tpu.dot_dimension_numbers<[1], [0], [0], [1], [0, 0, 1, 1], [], []>} : vector<8x128xbf16>, vector<128x128xbf16>, vector<8x128xf32> -> vector<8x128xf32>
    %c0_3 = arith.constant 0 : index
    %c0_4 = arith.constant 0 : index
    %3 = vector.load %arg3[%c0_3, %c0_4] : memref<1x128xf32, #tpu.memory_space<vmem>>, vector<1x128xf32>
    %4 = vector.broadcast %3 : vector<1x128xf32> to vector<8x128xf32>
    %5 = arith.addf %2, %4 : vector<8x128xf32>
    %cst_5 = arith.constant 5.000000e-01 : f32
    %6 = vector.broadcast %cst_5 : f32 to vector<8x128xf32>
    %7 = arith.mulf %6, %5 : vector<8x128xf32>
    %cst_6 = arith.constant 0.707106769 : f32
    %8 = vector.broadcast %cst_6 : f32 to vector<8x128xf32>
    %9 = arith.mulf %5, %8 : vector<8x128xf32>
    %10 = math.erf %9 : vector<8x128xf32>
    %cst_7 = arith.constant 1.000000e+00 : f32
    %11 = vector.broadcast %cst_7 : f32 to vector<8x128xf32>
    %12 = arith.addf %11, %10 : vector<8x128xf32>
    %13 = arith.mulf %7, %12 : vector<8x128xf32>
    %cst_8 = arith.constant dense<0.000000e+00> : vector<8xf32>
    %14 = vector.multi_reduction <add>, %13, %cst_8 [1] : vector<8x128xf32> to vector<8xf32>
    %15 = vector.shape_cast %14 : vector<8xf32> to vector<8x1xf32>
    %cst_9 = arith.constant 3.125000e-02 : f32
    %16 = vector.broadcast %cst_9 : f32 to vector<8x1xf32>
    %17 = arith.mulf %15, %16 : vector<8x1xf32>
    %18 = vector.broadcast %17 : vector<8x1xf32> to vector<8x128xf32>
    %19 = arith.subf %13, %18 : vector<8x128xf32>
    %20 = tpu.iota {dimensions = array<i32: 1>} : vector<1x128xi32>
    %c32_i32 = arith.constant 32 : i32
    %21 = vector.broadcast %c32_i32 : i32 to vector<1x128xi32>
    %22 = arith.cmpi slt, %20, %21 : vector<1x128xi32>
    %cst_10 = arith.constant 0.000000e+00 : f32
    %23 = vector.shape_cast %22 : vector<1x128xi1> to vector<1x128xi1>
    %24 = vector.broadcast %23 : vector<1x128xi1> to vector<8x128xi1>
    %25 = vector.broadcast %cst_10 : f32 to vector<8x128xf32>
    %26 = arith.select %24, %19, %25 : vector<8x128xi1>, vector<8x128xf32>
    %27 = arith.mulf %26, %26 : vector<8x128xf32>
    %cst_11 = arith.constant dense<0.000000e+00> : vector<8xf32>
    %28 = vector.multi_reduction <add>, %27, %cst_11 [1] : vector<8x128xf32> to vector<8xf32>
    %29 = vector.shape_cast %28 : vector<8xf32> to vector<8x1xf32>
    %cst_12 = arith.constant 3.125000e-02 : f32
    %30 = vector.broadcast %cst_12 : f32 to vector<8x1xf32>
    %31 = arith.mulf %29, %30 : vector<8x1xf32>
    %cst_13 = arith.constant 9.99999996E-13 : f32
    %32 = vector.broadcast %cst_13 : f32 to vector<8x1xf32>
    %33 = arith.addf %31, %32 : vector<8x1xf32>
    %34 = math.rsqrt %33 : vector<8x1xf32>
    %35 = vector.broadcast %34 : vector<8x1xf32> to vector<8x128xf32>
    %36 = arith.mulf %26, %35 : vector<8x128xf32>
    %c0_14 = arith.constant 0 : index
    %c0_15 = arith.constant 0 : index
    %37 = vector.load %arg4[%c0_14, %c0_15] : memref<1x128xf32, #tpu.memory_space<vmem>>, vector<1x128xf32>
    %38 = vector.broadcast %37 : vector<1x128xf32> to vector<8x128xf32>
    %39 = arith.mulf %36, %38 : vector<8x128xf32>
    %c0_16 = arith.constant 0 : index
    %c0_17 = arith.constant 0 : index
    %40 = vector.load %arg5[%c0_16, %c0_17] : memref<1x128xf32, #tpu.memory_space<vmem>>, vector<1x128xf32>
    %41 = vector.broadcast %40 : vector<1x128xf32> to vector<8x128xf32>
    %42 = arith.addf %39, %41 : vector<8x128xf32>
    %c0_18 = arith.constant 0 : index
    %c0_19 = arith.constant 0 : index
    %43 = vector.load %arg6[%c0_18, %c0_19] : memref<8x128xf32, #tpu.memory_space<vmem>>, vector<8x128xf32>
    tpu.vector_store %arg6[%c0_18, %c0_19], %42 {strides = array<i32>} : memref<8x128xf32, #tpu.memory_space<vmem>>, vector<8x128xf32>,
    return
  }
  func.func @transform_0(%arg0: i32) -> (i32, i32) {
    %c0_i32 = arith.constant 0 : i32
    %c0_i32_0 = arith.constant 0 : i32
    return %arg0, %c0_i32 : i32, i32
  }
  func.func @transform_1(%arg0: i32) -> (i32, i32) {
    %c0_i32 = arith.constant 0 : i32
    %c0_i32_0 = arith.constant 0 : i32
    %c0_i32_1 = arith.constant 0 : i32
    return %c0_i32, %c0_i32_0 : i32, i32
  }
  func.func @transform_2(%arg0: i32) -> (i32, i32) {
    %c0_i32 = arith.constant 0 : i32
    %c0_i32_0 = arith.constant 0 : i32
    %c0_i32_1 = arith.constant 0 : i32
    return %c0_i32, %c0_i32_0 : i32, i32
  }
  func.func @transform_3(%arg0: i32) -> (i32, i32) {
    %c0_i32 = arith.constant 0 : i32
    %c0_i32_0 = arith.constant 0 : i32
    %c0_i32_1 = arith.constant 0 : i32
    return %c0_i32, %c0_i32_0 : i32, i32
  }
  func.func @transform_4(%arg0: i32) -> (i32, i32) {
    %c0_i32 = arith.constant 0 : i32
    %c0_i32_0 = arith.constant 0 : i32
    %c0_i32_1 = arith.constant 0 : i32
    return %c0_i32, %c0_i32_0 : i32, i32
  }
  func.func @transform_5(%arg0: i32) -> (i32, i32) {
    %c0_i32 = arith.constant 0 : i32
    %c0_i32_0 = arith.constant 0 : i32
    return %arg0, %c0_i32 : i32, i32
  }
}

</mosaic_0001>

<bundles_post_ra>
// kernel: tpu_custom_call.1
= control target key start
LH: loop header
LB: loop body
LE: loop exit
PB: predicated region body
PF: predicated region fallthrough
CT: control target
= control target key end

     0   :  { %10 = vsyncpa [#allocation3], 0  ;;  %s956_s0 = inlined_call_operand.hbm [shape: bf16[16,128], index: 0, kind: input, shape index: {}]   ;;  %s957_s1 = inlined_call_operand.hbm [shape: bf16[128,128], index: 1, kind: input, shape index: {}]   ;;  %s958_s2 = inlined_call_operand.vmem [shape: f32[1,128], index: 2, kind: input, shape index: {}]   ;;  %s959_s3 = inlined_call_operand.vmem [shape: f32[1,128], index: 3, kind: input, shape index: {}]   ;;  %s960_s4 = inlined_call_operand.vmem [shape: f32[1,128], index: 4, kind: input, shape index: {}]   ;;  %s961_s5 = inlined_call_operand.hbm [shape: f32[16,128], index: 5, kind: output, shape index: {}]  }
   0x1   :  { %12 = vsyncpa [#allocation3 + $0x1], 0 }
   0x2   :  { %13 = vsyncpa [#allocation6], 0 }
   0x3   :  { %14 = vsyncpa [#allocation4], 0 }
   0x4   :  { %16 = vsyncpa [#allocation4 + $0x1], 0  ;;  %s789_s18 = smov 0   ;;  %s791_s19 = smov 0  }
   0x5   :  { %s793_s20 = smov 0   ;;  %s795_s21 = smov 0  }
   0x6 LB: > { %s810_s22 = sadd.s32 4294967295, %s750_s21   ;;  %s501_s23 = sadd.s32 4294967294, %s750_s21   ;;  %s750_s21 = sphi %s795_s21, %s983_s21   ;;  %s746_s20 = sphi %s793_s20, %s982_s20   ;;  %s742_s19 = sphi %s791_s19, %s981_s19   ;;  %s738_s18 = sphi %s789_s18, %s980_s18  }
   0x7   : > { %p42_p0 = scmp.ne.s32.totalorder %s742_s19, %s738_s18  ;;  %p962_p1 = scmp.eq.s32.totalorder %s810_s22, 0 }
   0x8   : > { %p156_p3 = scmp.eq.s32.totalorder %s501_s23, 1  ;;  %p502_p5 = scmp.ge.s32.totalorder %s750_s21, 1 }
   0x9   : > { %p819_p4 = por %p962_p1, %p42_p0  ;;  %p163_p7 = scmp.lt.s32.totalorder %s750_s21, 3 }
   0xa   : > { %p824_p6 = por %p156_p3, %p42_p0  ;;  %s752_s27 = smov [#allocation5]  }
   0xb   : > { %s966_s24 = scalar_select %p819_p4, 1, 0 }
   0xc   : > { %s967_s25 = scalar_select %p824_p6, 1, 0 }
   0xd   : > { %p829_p8 = pnand %p502_p5, %p163_p7  ;;  %s175_s28 = sshll.u32 %s752_s27, 4  ;;  %s176_s28 = int_to_ptr.vmem [resolvable:$true] %s175_s28 }
   0xe   : > { %s843_s30 = sadd.s32 1, %s750_s21   ;;  %s29_s6 = sadd.s32 1, %s746_s20 }
   0xf   : > { %s968_s26 = scalar_select %p829_p8, 1, 0 }
  0x10   : > { %p563_p9 = pneg %p829_p8  ;;  %s26_s7 = ssub.s32 %s750_s21, %s843_s30 }
  0x11   : > { %s639_s8 = scalar_lea.vmem %s176_s28, 1024  ;;  %p647_p5 = scmp.lt.s32.totalorder %s176_s28, %s176_s28 }
  0x12   : > { %p838_p11 = pnand %p563_p9, %p962_p1  ;;  %p640_p13 = scmp.ne.s32.totalorder %s176_s28, %s639_s8 }
  0x13   : > { %p648_p7 = scmp.lt.s32.totalorder %s639_s8, %s639_s8 }
  0x14   : > { %p630_p12 = pneg %p838_p11 }
  0x15   : > { %p649_p10 = por %p648_p7, %p647_p5 }
  0x16   : > { %p642_p0 = pnand %p640_p13, %p630_p12 }
  0x18   : > { %p643_p3 = pneg %p642_p0 }
  0x1a   : > { %p650_p2 = pnand %p649_p10, %p643_p3 }
  0x1c   : > { %653 = shalt.err (!%p650_p2)
}
  0x1d   : > { %s753_s9 = smov 64   ;;  %s754_s10 = smov 4  }
  0x1e   : > { %566 = dma.hbm_to_vmem [thread:$0]  (!%p838_p11), %s957_s1, 1024, %s176_s28, [#allocation6], %s753_s9, %s753_s9, %s754_s10  }
  0x1f   : > { %p27_p9 = scmp.eq.s32.totalorder %s26_s7, 0  ;;  %p36_p12 = scmp.ne.s32.totalorder %s746_s20, %s742_s19 }
  0x20   : > { %p37_p10 = scmp.eq.s32.totalorder %s750_s21, 0  ;;  %p576_p2 = scmp.lt.s32.totalorder %s750_s21, 2 }
  0x21   : > { %s860_s13 = scalar_select %p27_p9, %s746_s20, %s29_s6  }
  0x22   : > { %p38_p13 = por %p37_p10, %p36_p12  ;;  %p970_p0 = scmp.eq.s32.totalorder %s810_s22, 1 }
  0x23   : > { %s198_s15 = sand.u32 1, %s746_s20   ;;  %s506_s16 = sshll.u32 %s750_s21, 6 }
  0x24   : > { %p864_p3 = por %p970_p0, %p36_p12  ;;  %s505_s17 = sshll.u32 %s198_s15, 2 }
  0x25   : > { %s873_s29 = scalar_lea.hbm %s956_s0, %s506_s16  ;;  %s202_s28 = scalar_lea.vmem [#allocation2], %s505_s17 }
  0x26   : > { %s971_s14 = scalar_select %p864_p3, 1, 0 }
  0x27   : > { %s209_s6 = sshll.u32 %s202_s28, 4  ;;  %p875_p11 = pnand %p576_p2, %p38_p13  ;;  %s210_s6 = int_to_ptr.vmem [resolvable:$true] %s209_s6 }
  0x28   : > { %s199_s8 = scalar_lea.sflag [#allocation3], %s198_s15  ;;  %s654_s9 = scalar_lea.hbm %s873_s29, 64 }
  0x29   : > { %p655_p5 = scmp.ne.s32.totalorder %s873_s29, %s654_s9  ;;  %p656_p7 = pneg %p875_p11 }
  0x2a   : > { %s659_s12 = scalar_lea.hbm %s956_s0, 128  ;;  %p660_p10 = scmp.lt.s32.totalorder %s873_s29, %s956_s0 }
  0x2b   : > { %p657_p9 = pnand %p656_p7, %p655_p5  ;;  %p661_p2 = scmp.lt.s32.totalorder %s659_s12, %s654_s9 }
  0x2d   : > { %p658_p12 = pneg %p657_p9  ;;  %p662_p13 = por %p661_p2, %p660_p10 }
  0x2f   : > { %p663_p0 = pnand %p662_p13, %p658_p12 }
  0x31   : > { %666 = shalt.err (!%p663_p0)
}
  0x32   : > { %s667_s23 = scalar_lea.vmem %s210_s6, 64  ;;  %s755_s15 = smov [#allocation2]  }
  0x33   : > { %p668_p1 = scmp.ne.s32.totalorder %s210_s6, %s667_s23  ;;  %s672_s27 = sshll.u32 %s755_s15, 4  ;;  %s673_s27 = int_to_ptr.vmem [resolvable:$false] %s672_s27 }
  0x34   : > { %s674_s28 = scalar_lea.vmem %s673_s27, 128  ;;  %p675_p5 = scmp.lt.s32.totalorder %s210_s6, %s673_s27 }
  0x35   : > { %p670_p6 = pnand %p668_p1, %p656_p7  ;;  %p676_p9 = scmp.lt.s32.totalorder %s674_s28, %s667_s23 }
  0x37   : > { %p671_p3 = pneg %p670_p6  ;;  %p677_p4 = por %p676_p9, %p675_p5 }
  0x39   : > { %p678_p8 = pnand %p677_p4, %p671_p3 }
  0x3b   : > { %681 = shalt.err (!%p678_p8)
}
  0x3c   : > { %570 = dma.hbm_to_vmem [thread:$0]  (!%p875_p11), %s873_s29, 64, %s210_s6, %s199_s8  }
  0x3d   : > { %p973_p12 = scmp.ne.s32.totalorder %s968_s26, 0 }
  0x3e   : > { %s896_s9 = sand.u32 (!%p973_p12), 1, %s742_s19   ;;  %p974_p1 = scmp.ne.s32.totalorder (!%p973_p12), %s966_s24, 0 }
  0x3f   : > { %218 = sbr.rel (%p973_p12) target bundleno = 640 (0x280), region = 40  ;;  %s508_s10 = sshll.u32 (!%p973_p12), %s896_s9, 2 }
  0x40   : > { %s221_s11 = scalar_lea.sflag (!%p973_p12), [#allocation3], %s896_s9  ;;  %s900_s12 = scalar_lea.vmem (!%p973_p12), [#allocation2], %s508_s10 }
  0x44   : > { %725 = dma.done.wait (%p974_p1), %s221_s11, 64  }
  0x45   : > { %727 = vsyncadd (%p974_p1), %s221_s11, 4294967232  ;;  %p975_p4 = scmp.eq.s32.totalorder %s810_s22, 0 }
  0x47   : > { %729 = dma.done.wait (%p975_p4), [#allocation6], 1024   ;;  %p976_p6 = pmov %p975_p4 }
  0x48   : > { %v756_v0 = vmov 0.0   ;;  %vm757_vm0 = vmmov 0   ;;  %v616_v1 = vld [vmem:[#allocation5 + $0x38] sm:$0xff]   ;;  %v617_v2 = vld [vmem:[#allocation5 + $0x30] sm:$0xff]   ;;  %v618_v3 = vld [vmem:[#allocation5 + $0x28] sm:$0xff]   ;;  %v377_v21 = vlaneseq  ;;  %s510_s29 = sshll.u32 %s896_s9, 3 }
  0x49   : > { %731 = vsyncadd (%p976_p6), [#allocation6], 4294966272  ;;  %535 = vmatprep.subr.bf16.mxu0 %v756_v0  ;;  %551 = vmatprep.mubr.msk.bf16.mxu0 %vm757_vm0, %v756_v0  ;;  %v619_v4 = vld [vmem:[#allocation5 + $0x20] sm:$0xff]   ;;  %v620_v5 = vld [vmem:[#allocation5 + $0x18] sm:$0xff]   ;;  %s523_s17 = sshll.u32 %s810_s22, 7  ;;  %s254_s23 = scalar_lea.vmem [#allocation7], %s510_s29 }
  0x4a   : > { %536 = vmatpush3.bf16.msra.mxu0 %v616_v1  ;;  %v621_v6 = vld [vmem:[#allocation5 + $0x10] sm:$0xff]   ;;  %v622_v7 = vld [vmem:[#allocation5 + $0x8] sm:$0xff]   ;;  %v623_v8 = vld [vmem:[#allocation5] sm:$0xff]   ;;  %v378_v22 = vand.u32 127, %v377_v21  ;;  %s421_s15 = sshll.u32 %s254_s23, 4  ;;  %s419_s10 = scalar_lea.hbm %s961_s5, %s523_s17  ;;  %s422_s15 = int_to_ptr.vmem [resolvable:$true] %s421_s15 }
  0x4b   : > { %537 = vmatprep.subr.bf16.mxu0 %v756_v0  ;;  %v256_v9 = vld [vmem:[%s900_s12] sm:$0xf]  ;;  %s408_s11 = scalar_lea.sflag [#allocation4], %s896_s9  ;;  %s682_s12 = scalar_lea.vmem %s422_s15, 128 }
  0x4c   : > { %v511_v10 = vld [vmem:[%s958_s2] ss:$0 sm:$0xff]  ;;  %vm379_vm1 = vcmp.lt.s32.totalorder %v378_v22, 32  ;;  %p683_p8 = scmp.ne.s32.totalorder %s422_s15, %s682_s12  ;;  %p977_p3 = scmp.ne.s32.totalorder %s971_s14, 0 }
  0x4d   : > { %v520_v32 = vld [vmem:[%s959_s3] ss:$0 sm:$0xff]  ;;  %s758_s24 = smov [#allocation7]  }
  0x4e   : > { %538 = vmatpush3.bf16.msra.mxu0 %v617_v2  ;;  %v521_v34 = vld [vmem:[%s960_s4] ss:$0 sm:$0xff]  ;;  %p684_p11 = pnand %p683_p8, %p977_p3  ;;  %s686_s26 = sshll.u32 %s758_s24, 4  ;;  %s687_s26 = int_to_ptr.vmem [resolvable:$false] %s686_s26 }
  0x4f   : > { %539 = vmatprep.subr.bf16.mxu0 %v756_v0  ;;  %s688_s22 = scalar_lea.vmem %s687_s26, 256  ;;  %p689_p10 = scmp.lt.s32.totalorder %s422_s15, %s687_s26 }
  0x50   : > { %p685_p7 = pneg %p684_p11  ;;  %p690_p2 = scmp.lt.s32.totalorder %s688_s22, %s682_s12 }
  0x52   : > { %540 = vmatpush3.bf16.msra.mxu0 %v618_v3  ;;  %p691_p13 = por %p690_p2, %p689_p10 }
  0x53   : > { %541 = vmatprep.subr.bf16.mxu0 %v756_v0 }
  0x54   : > { %p692_p0 = pnand %p691_p13, %p685_p7 }
  0x56   : > { %542 = vmatpush3.bf16.msra.mxu0 %v619_v4 }
  0x57   : > { %543 = vmatprep.subr.bf16.mxu0 %v756_v0 }
  0x5a   : > { %544 = vmatpush3.bf16.msra.mxu0 %v620_v5 }
  0x5b   : > { %545 = vmatprep.subr.bf16.mxu0 %v756_v0 }
  0x5e   : > { %546 = vmatpush3.bf16.msra.mxu0 %v621_v6 }
  0x5f   : > { %547 = vmatprep.subr.bf16.mxu0 %v756_v0 }
  0x62   : > { %548 = vmatpush3.bf16.msra.mxu0 %v622_v7 }
  0x63   : > { %549 = vmatprep.subr.bf16.mxu0 %v756_v0 }
  0x66   : > { %550 = vmatpush3.bf16.msra.mxu0 %v623_v8 }
  0x69   : > { %552 = vmatmul.mubr.bf16.vlgmr.msra.gmra.mxu0 %v256_v9 }
 0x129   : > { %v362_v11 = vpop.f32.mrf.mxu0 }
 0x12a   : > { %v363_v12 = vadd.f32 %v511_v10, %v362_v11 }
 0x12b   : > { %v553_v13 = vpop.f32.mrf.mxu0 }
 0x12c   : > { %v369_v14 = vmul.f32 0.70710677, %v363_v12  ;;  %v368_v18 = vmul.f32 0.5, %v363_v12 }
 0x12d   : > { %v365_v15 = vpop.f32.mrf.mxu0 }
 0x12e   : > { %624 = verf.f32 %v369_v14 }
 0x12f   : > { %v554_v16 = vpop.f32.mrf.mxu0 }
 0x13b   : > { %v625_v17 = vpop.eup %624 }
 0x13c   : > { %v371_v19 = vadd.f32 1.0, %v625_v17 }
 0x13e   : > { %v372_v20 = vmul.f32 %v371_v19, %v368_v18 }
 0x140   : > { %373 = vadd.xlane.f32.xlu0 %v372_v20 }
 0x1c9   : > { %v374_v23 = vpop.xlane.xlu0 %373 }
 0x1ca   : > { %v375_v24 = vmul.f32 0.03125, %v374_v23 }
 0x1cc   : > { %v376_v25 = vsub.f32 %v372_v20, %v375_v24 }
 0x1ce   : > { %v382_v26 = vsel %vm379_vm1, %v376_v25, 0.0 }
 0x1cf   : > { %v383_v27 = vmul.f32 %v382_v26, %v382_v26 }
 0x1d1   : > { %384 = vadd.xlane.f32.xlu0 %v383_v27 }
 0x25a   : > { %v385_v28 = vpop.xlane.xlu0 %384 }
 0x25b   : > { %v386_v29 = vmul.f32 0.03125, %v385_v28 }
 0x25d   : > { %v387_v30 = vadd.f32 1e-12, %v386_v29 }
 0x25f   : > { %626 = vrsqrt.f32 %v387_v30 }
 0x26c   : > { %v627_v31 = vpop.eup %626 }
 0x26d   : > { %v389_v33 = vmul.f32 %v627_v31, %v382_v26 }
 0x26f   : > { %v397_v35 = vmul.f32 %v520_v32, %v389_v33 }
 0x271   : > { %v405_v36 = vadd.f32 %v521_v34, %v397_v35 }
 0x273   : > { %406 = vst [vmem:[%s254_s23] sm:$0xff] %v405_v36 }
 0x274   : > { %695 = shalt.err (!%p692_p0)
}
 0x275   : > { %s696_s29 = scalar_lea.hbm %s419_s10, 128  ;;  %s700_s7 = scalar_lea.hbm %s961_s5, 256 }
 0x276   : > { %p697_p5 = scmp.ne.s32.totalorder %s419_s10, %s696_s29  ;;  %p701_p1 = scmp.lt.s32.totalorder %s419_s10, %s961_s5 }
 0x277   : > { %p702_p4 = scmp.lt.s32.totalorder %s700_s7, %s696_s29 }
 0x278   : > { %p698_p9 = pnand %p697_p5, %p977_p3 }
 0x279   : > { %p703_p6 = por %p702_p4, %p701_p1 }
 0x27a   : > { %p699_p12 = pneg %p698_p9 }
 0x27c   : > { %p704_p8 = pnand %p703_p6, %p699_p12 }
 0x27e   : > { %707 = shalt.err (!%p704_p8)
}
 0x27f   : > { %561 = dma.vmem_to_hbm [thread:$0]  (%p977_p3), %s422_s15, 128, %s419_s10, %s408_s11  }
 0x280 PF: > { %s433_s17 = sand.u32 1, %s738_s18   ;;  %p978_p11 = scmp.ne.s32.totalorder %s967_s25, 0 }
 0x281   : > { %p979_p7 = scmp.ge.s32.totalorder %s750_s21, 2  ;;  %s434_s23 = scalar_lea.sflag [#allocation4], %s433_s17 }
 0x283   : > { %p572_p10 = pnand %p979_p7, %p978_p11 }
 0x285   : > { %p573_p2 = pneg %p572_p10 }
 0x287   : > { %733 = dma.done.wait (%p573_p2), %s434_s23, 128  }
 0x288   : > { %735 = vsyncadd (%p573_p2), %s434_s23, 4294967168  ;;  %p19_p13 = scmp.ge.s32.totalorder %s843_s30, 4   ;;  %s980_s18 = smov %s742_s19 }
 0x289   : > { %s981_s19 = smov %s746_s20  ;;  %s982_s20 = smov %s860_s13 }
 0x28a   : > { %s983_s21 = smov %s843_s30  ;;  %21 = sbr.rel (!%p19_p13) target bundleno = 6 (0x6), region = 89 }
 0x28f   :  { %439 = vsyncpa [#allocation3], 1 }
 0x290   :  { %441 = vsyncpa [#allocation3 + $0x1], 1 }
 0x291   :  { %442 = vsyncpa [#allocation6], 1 }
 0x292   :  { %443 = vsyncpa [#allocation4], 1 }
 0x293   :  { %445 = vsyncpa [#allocation4 + $0x1], 1 }

</bundles_post_ra>
